<compile_context>
chip_gen: v7x
topology: tpu7x:2x2x1
jax: 0.10.0
libtpu: 0.0.40
codegen_flags: <defaults>
</compile_context>

<pallas_src>
import functools
import math

import jax
import jax.numpy as jnp
import numpy as np
from jax import lax
from jax.experimental import pallas as pl
from jax.experimental.pallas import tpu as pltpu

EPS = 1e-12       # module's clamp_min eps
BN_EPS = 1e-5     # nn.BatchNorm2d default eps
LANE = 128


def _round_up(x, m):
    return ((x + m - 1) // m) * m


# --------------------------- phase 1: S / Z accumulation ---------------------------

def _phase1_kernel(src_ref, w_src_ref, b_src_ref, wk2_ref, bk2_ref, saug_ref,
                   *, c_out, tile_n, n_valid, needs_mask):
    t = pl.program_id(1)

    @pl.when(t == 0)
    def _():
        saug_ref[...] = jnp.zeros_like(saug_ref)

    src = src_ref[0]                                        # [C_in, tile_n] bf16
    # Fused first layer of key_project + value_project (+ a constant ones row):
    #   rows [0, C)   -> key-branch hidden (post ReLU)
    #   rows [C, 2C)  -> value (post ReLU)
    #   row  2C       -> relu(0*x + 1) == 1  (gives Z^T via the same matmul below)
    h = jnp.maximum(
        jnp.dot(w_src_ref[...], src, preferred_element_type=jnp.float32)
        + b_src_ref[...], 0.0)                              # [2C+1, tile_n] f32
    hk = h[:c_out, :]
    vaug = h[c_out:, :]                                     # [C+1, tile_n]: value rows + ones

    key = jnp.logaddexp(                                    # softplus (== nn.Softplus)
        jnp.dot(wk2_ref[...], hk, preferred_element_type=jnp.float32)
        + bk2_ref[...], 0.0)                                # [C, tile_n]

    if needs_mask:
        # Padded columns are not inert (softplus(bias) != 0): zero key there so
        # they contribute nothing to either S or Z.
        col = t * tile_n + lax.broadcasted_iota(jnp.int32, key.shape, 1)
        key = jnp.where(col < n_valid, key, 0.0)

    # One MXU matmul accumulates both S (rows 0..C-1) and Z^T (row C).
    saug_ref[0] += jnp.dot(vaug, key.T, preferred_element_type=jnp.float32)


# --------------------------- phase 2: per-tile output ------------------------------

def _phase2_kernel(tgt_ref, saug_ref, wq1_ref, wq2_ref, bq_ref, out_ref,
                   *, c_out, approx_recip):
    tgt = tgt_ref[0]                                        # [C_in, tile_n] bf16
    hq = jnp.maximum(
        jnp.dot(wq1_ref[...], tgt, preferred_element_type=jnp.float32)
        + bq_ref[:, 0:1], 0.0)
    query = jnp.logaddexp(
        jnp.dot(wq2_ref[...], hq, preferred_element_type=jnp.float32)
        + bq_ref[:, 1:2], 0.0)                              # [C, tile_n]

    # Single matmul produces num (rows 0..C-1) and denom (row C = Z^T @ query).
    nd = jnp.dot(saug_ref[0], query, preferred_element_type=jnp.float32)
    num = nd[:c_out, :]
    denom = jnp.maximum(nd[c_out:c_out + 1, :], EPS)
    if approx_recip:
        result = num * pl.reciprocal(denom, approx=True)    # EUP slot, cheap
    else:
        result = num / denom                                # exact path
    out_ref[0] = result.astype(out_ref.dtype)


# --------------------------------- wrapper -----------------------------------------

def _pick_tile_n(n, c_in, c_out, max_tile_n, vmem_budget_bytes):
    """Largest lane-dense tile whose per-step working set fits the VMEM budget."""
    n128 = _round_up(n, LANE)
    cin_p = _round_up(max(c_in, 1), 8)
    c_p = _round_up(max(c_out, 1), 8)
    rows_src = _round_up(2 * c_out + 1, 8)
    per_col = (2 * 2 * cin_p                       # bf16 input tile, double-buffered
               + 2 * 4 * c_p                       # f32 output tile, double-buffered
               + 4 * (rows_src + 3 * c_p + 8))     # f32 intermediates (h, key/query, nd)
    tile = max(LANE, min(n128, _round_up(max_tile_n, LANE)))
    while tile > LANE and tile * per_col > vmem_budget_bytes:
        tile -= LANE
    return tile


def global_context_attention(target, source, params, *,
                             max_tile_n=2048,
                             approx_reciprocal=True,
                             vmem_budget_bytes=12 * 1024 * 1024):
    """target, source: [B, C_in, H, W] float32 (NCHW). Returns [B, C_out, H, W] f32."""
    B, C_in, H, W = target.shape
    n = H * W
    c_out = params["wv"].shape[0]

    tile_n = _pick_tile_n(n, C_in, c_out, max_tile_n, vmem_budget_bytes)
    n_pad = _round_up(n, tile_n)
    nt = n_pad // tile_n
    needs_mask = n_pad != n

    # Host-side packing: fuse src-path first-layer weights (+ zero row -> ones
    # row after bias 1 + ReLU), stack the query biases, cast the HBM-heavy
    # tensors (slabs + first-layer weights) to bf16.
    w_src = jnp.concatenate(
        [params["wk1"], params["wv"], jnp.zeros((1, C_in), jnp.float32)], axis=0)
    b_src = jnp.concatenate(
        [params["bk1"], params["bv"], jnp.ones((1, 1), jnp.float32)], axis=0)
    bq = jnp.concatenate([params["bq1"], params["bq2"]], axis=1)        # [C, 2]

    tgt = target.reshape(B, C_in, n).astype(jnp.bfloat16)
    src = source.reshape(B, C_in, n).astype(jnp.bfloat16)
    if needs_mask:
        pad = ((0, 0), (0, 0), (0, n_pad - n))
        tgt = jnp.pad(tgt, pad)
        src = jnp.pad(src, pad)
    w_src_b = w_src.astype(jnp.bfloat16)
    wq1_b = params["wq1"].astype(jnp.bfloat16)

    def const(shape):
        return pl.BlockSpec(shape, lambda b, t, _n=len(shape): (0,) * _n)

    vmem_limit = 32 * 1024 * 1024   # explicit, with headroom; safe on v5e/v6e/v7x

    # ---- phase 1: S_aug[b] = [[value @ key^T], [Z^T]] accumulated over src tiles ----
    s_aug = pl.pallas_call(
        functools.partial(_phase1_kernel, c_out=c_out, tile_n=tile_n,
                          n_valid=n, needs_mask=needs_mask),
        out_shape=jax.ShapeDtypeStruct((B, c_out + 1, c_out), jnp.float32),
        grid_spec=pltpu.PrefetchScalarGridSpec(
            num_scalar_prefetch=0,
            grid=(B, nt),
            in_specs=[
                pl.BlockSpec((1, C_in, tile_n), lambda b, t: (b, 0, t)),
                const((2 * c_out + 1, C_in)),
                const((2 * c_out + 1, 1)),
                const((c_out, c_out)),
                const((c_out, 1)),
            ],
            out_specs=pl.BlockSpec((1, c_out + 1, c_out), lambda b, t: (b, 0, 0)),
        ),
        compiler_params=pltpu.CompilerParams(
            dimension_semantics=("parallel", "arbitrary"),
            vmem_limit_bytes=vmem_limit),
    )(src, w_src_b, b_src, params["wk2"], params["bk2"])

    # ---- phase 2: per tgt tile, project query and emit num/denom via one matmul ----
    out = pl.pallas_call(
        functools.partial(_phase2_kernel, c_out=c_out,
                          approx_recip=approx_reciprocal),
        out_shape=jax.ShapeDtypeStruct((B, c_out, n_pad), jnp.float32),
        grid_spec=pltpu.PrefetchScalarGridSpec(
            num_scalar_prefetch=0,
            grid=(B, nt),
            in_specs=[
                pl.BlockSpec((1, C_in, tile_n), lambda b, t: (b, 0, t)),
                pl.BlockSpec((1, c_out + 1, c_out), lambda b, t: (b, 0, 0)),
                const((c_out, C_in)),
                const((c_out, c_out)),
                const((c_out, 2)),
            ],
            out_specs=pl.BlockSpec((1, c_out, tile_n), lambda b, t: (b, 0, t)),
        ),
        compiler_params=pltpu.CompilerParams(
            # Both axes parallel -> both v7x TensorCores get work even at B == 1.
            dimension_semantics=("parallel", "parallel"),
            vmem_limit_bytes=vmem_limit),
    )(tgt, s_aug, wq1_b, params["wq2"], bq)

    if needs_mask:
        out = out[:, :, :n]
    return out.reshape(B, c_out, H, W)


# ---------------- parameter construction (deterministic, in-script) ----------------

def _xavier_uniform(key, c_out, c_in):
    # nn.init.xavier_uniform_ on a [c_out, c_in, 1, 1] conv weight.
    bound = math.sqrt(6.0 / (c_in + c_out))
    return jax.random.uniform(key, (c_out, c_in), jnp.float32, -bound, bound)


def init_params(key, c_in, c_out):
    # Eval-mode BN (gamma=1, beta=0, mean=0, var=1) folded into each conv:
    #   W' = W * gamma / sqrt(var + eps),  b' = (b - mean) * scale + beta
    bn_scale = 1.0 / math.sqrt(1.0 + BN_EPS)
    ks = jax.random.split(key, 5)

    def conv_bn(k, ci, co):
        w = _xavier_uniform(k, co, ci) * bn_scale
        b = jnp.zeros((co, 1), jnp.float32)
        return w, b

    wq1, bq1 = conv_bn(ks[0], c_in, c_out)
    wq2, bq2 = conv_bn(ks[1], c_out, c_out)
    wk1, bk1 = conv_bn(ks[2], c_in, c_out)
    wk2, bk2 = conv_bn(ks[3], c_out, c_out)
    wv, bv = conv_bn(ks[4], c_in, c_out)
    return dict(wq1=wq1, bq1=bq1, wq2=wq2, bq2=bq2,
                wk1=wk1, bk1=bk1, wk2=wk2, bk2=bk2,
                wv=wv, bv=bv)


# ---------------- pure-JAX reference (silent correctness check) --------------------

def _reference(target, source, p, *, mirror_bf16=True):
    """Reference forward. mirror_bf16 rounds the kernel's bf16-cast tensors the
    same way (products of bf16 values are exact in f32, so this isolates the
    intentional precision decision)."""
    B, C_in, H, W = target.shape
    n = H * W
    rnd = ((lambda a: a.astype(jnp.bfloat16).astype(jnp.float32))
           if mirror_bf16 else (lambda a: a))
    tgt = rnd(target).reshape(B, C_in, n)
    src = rnd(source).reshape(B, C_in, n)
    wq1, wk1, wv = rnd(p["wq1"]), rnd(p["wk1"]), rnd(p["wv"])

    def proj2(x, w1, b1, w2, b2):
        h = jnp.maximum(jnp.einsum("oc,bcn->bon", w1, x) + b1[None], 0.0)
        return jax.nn.softplus(jnp.einsum("oc,bcn->bon", w2, h) + b2[None])

    query = proj2(tgt, wq1, p["bq1"], p["wq2"], p["bq2"])
    key = proj2(src, wk1, p["bk1"], p["wk2"], p["bk2"])
    value = jnp.maximum(jnp.einsum("oc,bcn->bon", wv, src) + p["bv"][None], 0.0)

    S = jnp.einsum("bon,bpn->bop", value, key)
    Z = jnp.sum(key, axis=2)                               # [B, C_out]
    denom = jnp.einsum("bc,bcn->bn", Z, query)[:, None]    # [B, 1, N]
    V = jnp.einsum("bop,bpn->bon", S, query) / jnp.maximum(denom, EPS)
    return V.reshape(B, -1, H, W)


if __name__ == "__main__":
    root = jax.random.PRNGKey(0)

    # Case 1: multi-tile accumulation path (N=256 split into two 128-lane tiles),
    # exact reciprocal -> tight tolerance.
    B, C_in, C_out, H, W = 2, 4, 8, 16, 16
    k_t, k_s, k_p, root = jax.random.split(root, 4)
    target = jax.random.normal(k_t, (B, C_in, H, W), jnp.float32)
    source = jax.random.normal(k_s, (B, C_in, H, W), jnp.float32)
    params = init_params(k_p, C_in, C_out)
    out = jax.block_until_ready(global_context_attention(
        target, source, params, max_tile_n=128, approx_reciprocal=False))
    ref = jax.block_until_ready(_reference(target, source, params))
    assert out.shape == (B, C_out, H, W)
    assert np.allclose(np.asarray(out), np.asarray(ref), rtol=1e-4, atol=1e-4)

    # Case 2: non-multiple-of-128 spatial size (exercises padding + key masking)
    # with the approximate-reciprocal fast path (looser tolerance).
    B, C_in, C_out, H, W = 1, 6, 16, 13, 11
    k_t, k_s, k_p = jax.random.split(root, 3)
    target = jax.random.normal(k_t, (B, C_in, H, W), jnp.float32)
    source = jax.random.normal(k_s, (B, C_in, H, W), jnp.float32)
    params = init_params(k_p, C_in, C_out)
    out = jax.block_until_ready(global_context_attention(target, source, params))
    ref = jax.block_until_ready(_reference(target, source, params))
    assert out.shape == (B, C_out, H, W)
    assert np.allclose(np.asarray(out), np.asarray(ref), rtol=5e-3, atol=5e-3)

    print("KERNEL_OK")
</pallas_src>

<mosaic_0001>
module attributes {stable_mosaic.version = 11 : i64} {
  func.func @_phase1_kernel(%arg0: i32, %arg1: i32, %arg2: memref<1x4x128xbf16, #tpu.memory_space<vmem>>, %arg3: memref<17x4xbf16, #tpu.memory_space<vmem>>, %arg4: memref<17x1xf32, #tpu.memory_space<vmem>>, %arg5: memref<8x8xf32, #tpu.memory_space<vmem>>, %arg6: memref<8x1xf32, #tpu.memory_space<vmem>>, %arg7: memref<1x9x8xf32, #tpu.memory_space<vmem>>) attributes {dimension_semantics = [#tpu.dimension_semantics<parallel>, #tpu.dimension_semantics<arbitrary>], iteration_bounds = array<i64: 2, 2>, scalar_prefetch = 0 : i64, scratch_operands = 0 : i64, tpu.core_type = #tpu.core_type<tc>, window_params = [{transform_indices = @transform_0, window_bounds = array<i64: 1, 4, 128>}, {pipeline_mode = #tpu.pipeline_mode<synchronous>, transform_indices = @transform_1, window_bounds = array<i64: 17, 4>}, {pipeline_mode = #tpu.pipeline_mode<synchronous>, transform_indices = @transform_2, window_bounds = array<i64: 17, 1>}, {pipeline_mode = #tpu.pipeline_mode<synchronous>, transform_indices = @transform_3, window_bounds = array<i64: 8, 8>}, {pipeline_mode = #tpu.pipeline_mode<synchronous>, transform_indices = @transform_4, window_bounds = array<i64: 8, 1>}, {transform_indices = @transform_5, window_bounds = array<i64: 1, 9, 8>}]} {
    %c0_i32 = arith.constant 0 : i32
    %0 = arith.cmpi eq, %arg1, %c0_i32 : i32
    %1 = arith.extui %0 : i1 to i32
    %c0_i32_0 = arith.constant 0 : i32
    %2 = arith.cmpi ne, %1, %c0_i32_0 : i32
    scf.if %2 {
      %cst_22 = arith.constant 0.000000e+00 : f32
      %41 = vector.broadcast %cst_22 : f32 to vector<1x9x8xf32>
      %c0_23 = arith.constant 0 : index
      %c0_24 = arith.constant 0 : index
      %c0_25 = arith.constant 0 : index
      %42 = vector.load %arg7[%c0_23, %c0_24, %c0_25] : memref<1x9x8xf32, #tpu.memory_space<vmem>>, vector<1x9x8xf32>
      tpu.vector_store %arg7[%c0_23, %c0_24, %c0_25], %41 {strides = array<i32>} : memref<1x9x8xf32, #tpu.memory_space<vmem>>, vector<1x9x8xf32>,
    } else {
    }
    %c0 = arith.constant 0 : index
    %c0_1 = arith.constant 0 : index
    %c0_2 = arith.constant 0 : index
    %3 = vector.load %arg2[%c0, %c0_1, %c0_2] : memref<1x4x128xbf16, #tpu.memory_space<vmem>>, vector<1x4x128xbf16>
    %4 = vector.shape_cast %3 : vector<1x4x128xbf16> to vector<4x128xbf16>
    %c0_3 = arith.constant 0 : index
    %c0_4 = arith.constant 0 : index
    %5 = vector.load %arg3[%c0_3, %c0_4] : memref<17x4xbf16, #tpu.memory_space<vmem>>, vector<17x4xbf16>
    %cst = arith.constant dense<0.000000e+00> : vector<17x128xf32>
    %6 = tpu.matmul %5, %4, %cst {dimension_numbers = #tpu.dot_dimension_numbers<[1], [0], [0], [1], [0, 0, 1, 1], [], []>} : vector<17x4xbf16>, vector<4x128xbf16>, vector<17x128xf32> -> vector<17x128xf32>
    %c0_5 = arith.constant 0 : index
    %c0_6 = arith.constant 0 : index
    %7 = vector.load %arg4[%c0_5, %c0_6] : memref<17x1xf32, #tpu.memory_space<vmem>>, vector<17x1xf32>
    %8 = vector.broadcast %7 : vector<17x1xf32> to vector<17x128xf32>
    %9 = arith.addf %6, %8 : vector<17x128xf32>
    %cst_7 = arith.constant 0.000000e+00 : f32
    %10 = vector.broadcast %cst_7 : f32 to vector<17x128xf32>
    %11 = arith.maximumf %9, %10 : vector<17x128xf32>
    %12 = vector.extract_strided_slice %11 {offsets = [0, 0], sizes = [8, 128], strides = [1, 1]} : vector<17x128xf32> to vector<8x128xf32>
    %13 = vector.extract_strided_slice %11 {offsets = [8, 0], sizes = [9, 128], strides = [1, 1]} : vector<17x128xf32> to vector<9x128xf32>
    %c0_8 = arith.constant 0 : index
    %c0_9 = arith.constant 0 : index
    %14 = vector.load %arg5[%c0_8, %c0_9] : memref<8x8xf32, #tpu.memory_space<vmem>>, vector<8x8xf32>
    %cst_10 = arith.constant dense<0.000000e+00> : vector<8x128xf32>
    %15 = tpu.matmul %14, %12, %cst_10 {dimension_numbers = #tpu.dot_dimension_numbers<[1], [0], [0], [1], [0, 0, 1, 1], [], []>} : vector<8x8xf32>, vector<8x128xf32>, vector<8x128xf32> -> vector<8x128xf32>
    %c0_11 = arith.constant 0 : index
    %c0_12 = arith.constant 0 : index
    %16 = vector.load %arg6[%c0_11, %c0_12] : memref<8x1xf32, #tpu.memory_space<vmem>>, vector<8x1xf32>
    %17 = vector.broadcast %16 : vector<8x1xf32> to vector<8x128xf32>
    %18 = arith.addf %15, %17 : vector<8x128xf32>
    %cst_13 = arith.constant 0.000000e+00 : f32
    %19 = vector.broadcast %cst_13 : f32 to vector<8x128xf32>
    %20 = arith.maximumf %18, %19 : vector<8x128xf32>
    %21 = vector.broadcast %cst_13 : f32 to vector<8x128xf32>
    %22 = arith.subf %18, %21 : vector<8x128xf32>
    %23 = arith.cmpf one, %22, %22 : vector<8x128xf32>
    %24 = vector.broadcast %cst_13 : f32 to vector<8x128xf32>
    %25 = arith.addf %18, %24 : vector<8x128xf32>
    %26 = math.absf %22 : vector<8x128xf32>
    %cst_14 = arith.constant 0.000000e+00 : f32
    %27 = vector.broadcast %cst_14 : f32 to vector<8x128xf32>
    %28 = arith.subf %27, %26 : vector<8x128xf32>
    %29 = math.exp %28 : vector<8x128xf32>
    %30 = math.log1p %29 : vector<8x128xf32>
    %31 = arith.addf %20, %30 : vector<8x128xf32>
    %32 = arith.select %23, %25, %31 : vector<8x128xi1>, vector<8x128xf32>
    %c0_15 = arith.constant 0 : index
    %c0_16 = arith.constant 0 : index
    %c0_17 = arith.constant 0 : index
    %33 = vector.load %arg7[%c0_15, %c0_16, %c0_17] : memref<1x9x8xf32, #tpu.memory_space<vmem>>, vector<1x9x8xf32>
    %34 = vector.shape_cast %33 : vector<1x9x8xf32> to vector<9x8xf32>
    %35 = tpu.transpose %32, [1, 0] : vector<8x128xf32> -> vector<128x8xf32>
    %cst_18 = arith.constant dense<0.000000e+00> : vector<9x8xf32>
    %36 = tpu.matmul %13, %35, %cst_18 {dimension_numbers = #tpu.dot_dimension_numbers<[1], [0], [0], [1], [0, 0, 1, 1], [], []>} : vector<9x128xf32>, vector<128x8xf32>, vector<9x8xf32> -> vector<9x8xf32>
    %37 = arith.addf %34, %36 : vector<9x8xf32>
    %c0_19 = arith.constant 0 : index
    %c0_20 = arith.constant 0 : index
    %c0_21 = arith.constant 0 : index
    %38 = vector.load %arg7[%c0_19, %c0_20, %c0_21] : memref<1x9x8xf32, #tpu.memory_space<vmem>>, vector<1x9x8xf32>
    %39 = vector.shape_cast %38 : vector<1x9x8xf32> to vector<9x8xf32>
    %40 = vector.shape_cast %37 : vector<9x8xf32> to vector<1x9x8xf32>
    tpu.vector_store %arg7[%c0_19, %c0_20, %c0_21], %40 {strides = array<i32>} : memref<1x9x8xf32, #tpu.memory_space<vmem>>, vector<1x9x8xf32>,
    return
  }
  func.func @transform_0(%arg0: i32, %arg1: i32) -> (i32, i32, i32) {
    %c0_i32 = arith.constant 0 : i32
    %c0_i32_0 = arith.constant 0 : i32
    return %arg0, %c0_i32, %arg1 : i32, i32, i32
  }
  func.func @transform_1(%arg0: i32, %arg1: i32) -> (i32, i32) {
    %c0_i32 = arith.constant 0 : i32
    %c0_i32_0 = arith.constant 0 : i32
    %c0_i32_1 = arith.constant 0 : i32
    return %c0_i32, %c0_i32_0 : i32, i32
  }
  func.func @transform_2(%arg0: i32, %arg1: i32) -> (i32, i32) {
    %c0_i32 = arith.constant 0 : i32
    %c0_i32_0 = arith.constant 0 : i32
    %c0_i32_1 = arith.constant 0 : i32
    return %c0_i32, %c0_i32_0 : i32, i32
  }
  func.func @transform_3(%arg0: i32, %arg1: i32) -> (i32, i32) {
    %c0_i32 = arith.constant 0 : i32
    %c0_i32_0 = arith.constant 0 : i32
    %c0_i32_1 = arith.constant 0 : i32
    return %c0_i32, %c0_i32_0 : i32, i32
  }
  func.func @transform_4(%arg0: i32, %arg1: i32) -> (i32, i32) {
    %c0_i32 = arith.constant 0 : i32
    %c0_i32_0 = arith.constant 0 : i32
    %c0_i32_1 = arith.constant 0 : i32
    return %c0_i32, %c0_i32_0 : i32, i32
  }
  func.func @transform_5(%arg0: i32, %arg1: i32) -> (i32, i32, i32) {
    %c0_i32 = arith.constant 0 : i32
    %c0_i32_0 = arith.constant 0 : i32
    %c0_i32_1 = arith.constant 0 : i32
    return %arg0, %c0_i32, %c0_i32_0 : i32, i32, i32
  }
}

</mosaic_0001>

<bundles_post_ra>
// kernel: tpu_custom_call.1
= control target key start
LH: loop header
LB: loop body
LE: loop exit
PB: predicated region body
PF: predicated region fallthrough
CT: control target
= control target key end

     0   :  { %s771_s18 = smov 0   ;;  %s773_s19 = smov 0   ;;  %s853_s0 = inlined_call_operand.vmem [shape: bf16[2,4,256], index: 0, kind: input, shape index: {}]   ;;  %s854_s1 = inlined_call_operand.vmem [shape: bf16[17,4], index: 1, kind: input, shape index: {}]   ;;  %s855_s2 = inlined_call_operand.vmem [shape: f32[17,1], index: 2, kind: input, shape index: {}]   ;;  %s856_s3 = inlined_call_operand.vmem [shape: f32[8,8], index: 3, kind: input, shape index: {}]   ;;  %s857_s4 = inlined_call_operand.vmem [shape: f32[8,1], index: 4, kind: input, shape index: {}]   ;;  %s858_s5 = inlined_call_operand.vmem [shape: f32[2,9,8], index: 5, kind: output, shape index: {}]  }
   0x1   :  { %s775_s20 = smov 0   ;;  %s777_s21 = smov 0  }
   0x2   :  { %s779_s22 = smov 0  }
   0x3 LB: > { %s24_s23 = sadd.s32 1, %s727_s20  ;;  %s27_s24 = sadd.s32 1, %s731_s21  ;;  %s735_s22 = sphi %s779_s22, %s15_s22   ;;  %s731_s21 = sphi %s777_s21, %s862_s21   ;;  %s727_s20 = sphi %s775_s20, %s861_s20   ;;  %s723_s19 = sphi %s773_s19, %s860_s19   ;;  %s719_s18 = sphi %s771_s18, %s859_s18  }
   0x4   : > { %p25_p0 = scmp.ge.s32.totalorder %s24_s23, 2  ;;  %p606_p1 = scmp.ge.s32.totalorder %s735_s22, 1 }
   0x5   : > { %p204_p2 = scmp.lt.s32.totalorder %s735_s22, 5 }
   0x6   : > { %s864_s23 = smov (%p25_p0, %s24_s23), 0  ;;  %s866_s24 = smov (!%p25_p0, %s27_s24), %s731_s21 }
   0x7   : > { %p205_p3 = pnand %p606_p1, %p204_p2  ;;  %p29_p4 = scmp.ge.s32.totalorder %s866_s24, 2 }
   0x8   : > { %p235_p5 = scmp.lt.s32.totalorder (!%p205_p3), %s723_s19, 1  ;;  %p237_p6 = scmp.lt.s32.totalorder (!%p205_p3), %s719_s18, 1 }
   0x9   : > { %s868_s24 = smov (%p29_p4, %s866_s24), 0  ;;  %208 = sbr.rel (%p205_p3) target bundleno = 716 (0x2cc), region = 40 }
   0xa   : > { %p611_p7 = scmp.ne.s32.totalorder (!%p205_p3), %s719_s18, 0 }
  0x10   : > { %s870_s19 = smov (!%p235_p5, %s723_s19), 1  ;;  %252 = sbr.rel (%p611_p7) target bundleno = 23 (0x17), region = 44 }
  0x11   : > { %s238_s25 = scalar_select %p237_p6, %s719_s18, 1 }
  0x12   : > { %s607_s26 = sshll.u32 %s870_s19, 1  ;;  %s619_s27 = sshll.u32 %s870_s19, 4  ;;  %vm253_vm0 = vcmask (!%p611_p7), 64512   ;;  %vm255_vm1 = vcmask (!%p611_p7), 57344   ;;  %v737_v0 = vmov (!%p611_p7), 0.0  }
  0x13   : > { %s240_s28 = sadd.s32 %s607_s26, %s238_s25  ;;  %s804_s6 = scalar_lea.vmem %s858_s5, %s619_s27 }
  0x14   : > { %s608_s7 = sshll.u32 %s240_s28, 1  ;;  %254 = vst.msk [vmem:[%s804_s6] sm:$0xff] (!%p611_p7), %vm253_vm0, %v737_v0 }
  0x15   : > { %s242_s10 = scalar_lea.vmem %s853_s0, %s608_s7  ;;  %256 = vst.msk [vmem:[%s804_s6 + $0x8] sm:$0x1] (!%p611_p7), %vm255_vm1, %v737_v0 }
  0x17 PF: > { %v257_v1 = vld [vmem:[%s242_s10] sm:$0x3]  ;;  %vm294_vm2 = vcmask 1041408   ;;  %vm287_vm3 = vcmask 31744   ;;  %v262_v5 = vld [vmem:[%s855_s2 + $0x8] sm:$0xff]  ;;  %v738_v7 = vmov 0  }
  0x18   : > { %v691_v2 = vld [vmem:[%s854_s1] sm:$0xff]   ;;  %644 = vmatprep.subr.msk.bf16.mxu0 %vm294_vm2, %v257_v1  ;;  %v296_v3 = vsel %vm294_vm2, %v257_v1, 0  ;;  %v692_v4 = vld [vmem:[%s854_s1 + $0x8] ss:$0 sps:$4 sm:$0x11]   ;;  %690 = vset.pattern.permute.xlu1 %v738_v7  ;;  %v739_v10 = vmov 0.0  }
  0x19   : > { %629 = vmatpush3.bf16.msra.mxu0 %v296_v3  ;;  %630 = vmatprep.mubr.msk.bf16.mxu0 %vm287_vm3, %v691_v2  ;;  %v261_v6 = vld [vmem:[%s855_s2] sm:$0xff]  ;;  %v263_v8 = vld [vmem:[%s855_s2 + $0x10] sm:$0x1]  ;;  %vm740_vm4 = vmmov 0   ;;  %vm356_vm5 = vcmask 64512   ;;  %vm528_vm8 = vcmask 57344  }
  0x1a   : > { %689 = vset.pattern.permute.xlu0 %v738_v7  ;;  %271 = vperm.xlu1 %690, %v262_v5   ;;  %v350_v9 = vld [vmem:[%s857_s4] sm:$0xff] }
  0x1b   : > { %266 = vperm.xlu0 %689, %v261_v6   ;;  %634 = vmatprep.subr.mxu1 %v739_v10  ;;  %v349_v20 = vld [vmem:[%s856_s3] sm:$0xff] }
  0x1c   : > { %631 = vmatmul.mubr.msk.bf16.vlgmr.msra.gmra.mrb[0].mxu0 %vm287_vm3, %v692_v4  ;;  %636 = vmatprep.mubr.msk.f32.mxu1 %vm740_vm4, %v739_v10  ;;  %v449_v44 = vld [vmem:[%s804_s6 + $0x8] sm:$0x1]  ;;  %v448_v45 = vld [vmem:[%s804_s6] sm:$0xff] }
  0x1e   : > { %276 = vperm.xlu1 %690, %v263_v8  }
  0x1f   : > { %353 = vperm.xlu0 %689, %v350_v9  }
  0x99   : > { %v272_v16 = vpop.permute.xlu1 %271 }
  0x9a   : > { %v267_v12 = vpop.permute.xlu0 %266 }
  0x9d   : > { %v277_v37 = vpop.permute.xlu1 %276 }
  0x9e   : > { %v354_v22 = vpop.permute.xlu0 %353 }
  0xef   : > { %v632_v11 = vpop.f32.mrb[0].mxu0 }
  0xf0   : > { %v332_v13 = vpop.f32.mrb[1].mxu0  ;;  %v341_v41 = vadd.f32 %v632_v11, %v277_v37 }
  0xf1   : > { %v333_v14 = vadd.f32 %v332_v13, %v267_v12  ;;  %v633_v15 = vpop.f32.mrb[2].mxu0 }
  0xf2   : > { %v335_v17 = vpop.f32.mrb[3].mxu0  ;;  %v348_v43 = vmax.f32 %v341_v41, 0.0 }
  0xf3   : > { %v346_v18 = vmax.f32 %v333_v14, 0.0  ;;  %v336_v19 = vadd.f32 %v335_v17, %v272_v16 }
  0xf5   : > { %v347_v21 = vmax.f32 %v336_v19, 0.0  ;;  %635 = vmatpush3.msra.mxu1 %v346_v18 }
  0xf6   : > { %637 = vmatmul.mubr.msk.f32.vlgmr.msra.gmra.mrb[0].mxu1 %vm356_vm5, %v349_v20 }
  0xf7   : > { %641 = vmatprep.mubr.f32.mxu1 %v347_v21 }
 0x1c9   : > { %v426_v23 = vpop.f32.mrb[0].mxu1 }
 0x1ca   : > { %v427_v24 = vadd.f32 %v426_v23, %v354_v22  ;;  %v638_v25 = vpop.f32.mrb[1].mxu1 }
 0x1cc   : > { %v433_v26 = vand.u32 2147483647, %v427_v24  ;;  %v430_v38 = vmax.f32 %v427_v24, 0.0  ;;  %vm431_vm7 = vcmp.ne.f32.partialorder %v427_v24, %v427_v24 }
 0x1ce   : > { %v434_v27 = vsub.f32 0.0, %v433_v26 }
 0x1d0   : > { %v435_v28 = vmul.f32 1.442695, %v434_v27 }
 0x1d2   : > { %693 = vpow2.f32 %v435_v28 }
 0x1dc   : > { %v694_v29 = vpop.eup %693 }
 0x1dd   : > { %v437_v30 = vadd.f32 1.0, %v694_v29  ;;  %v440_v31 = vmul.f32 -0.5, %v694_v29  ;;  %v443_v33 = vand.u32 2147483647, %v694_v29 }
 0x1df   : > { %695 = vlog2.f32 %v437_v30  ;;  %v441_v32 = vadd.f32 1.0, %v440_v31  ;;  %vm444_vm6 = vcmp.lt.f32.partialorder %v443_v33, 0.0004427343 }
 0x1e1   : > { %v442_v36 = vmul.f32 %v694_v29, %v441_v32 }
 0x1e9   : > { %v696_v34 = vpop.eup %695 }
 0x1ea   : > { %v439_v35 = vmul.f32 0.6931472, %v696_v34 }
 0x1ec   : > { %v445_v39 = vsel %vm444_vm6, %v442_v36, %v439_v35 }
 0x1ed   : > { %v446_v40 = vadd.f32 %v445_v39, %v430_v38 }
 0x1ef   : > { %v447_v42 = vsel %vm431_vm7, %v427_v24, %v446_v40 }
 0x1f0   : > { %639 = vmatprep.subr.mxu1 %v447_v42 }
 0x1f1   : > { %640 = vmatpush3.xpose.msra.mxu1 %v447_v42 }
 0x1f4   : > { %642 = vmatmul.mubr.f32.vlgmr.msra.gmra.mrb[2].mxu1 %v348_v43 }
 0x2c7   : > { %v643_v46 = vpop.f32.mrb[2].mxu1 }
 0x2c8   : > { %v526_v47 = vadd.f32 %v643_v46, %v449_v44  ;;  %v516_v48 = vpop.f32.mrb[3].mxu1 }
 0x2c9   : > { %v525_v49 = vadd.f32 %v516_v48, %v448_v45 }
 0x2ca   : > { %529 = vst.msk [vmem:[%s804_s6 + $0x8] sm:$0x1] %vm528_vm8, %v526_v47 }
 0x2cb   : > { %527 = vst.msk [vmem:[%s804_s6] sm:$0xff] %vm356_vm5, %v525_v49 }
 0x2cc PF: > { %s15_s22 = sadd.s32 1, %s735_s22   ;;  %s859_s18 = smov %s727_s20 }
 0x2cd   : > { %p12_p8 = scmp.ge.s32.totalorder %s15_s22, 6   ;;  %s860_s19 = smov %s731_s21 }
 0x2ce   : > { %s861_s20 = smov %s864_s23  ;;  %s862_s21 = smov %s868_s24 }
 0x2cf   :  { %14 = sbr.rel (!%p12_p8) target bundleno = 3 (0x3), region = 74 }

</bundles_post_ra>
